<compile_context>
chip_gen: v7x
topology: tpu7x:2x2x1
jax: 0.10.0
libtpu: 0.0.40
codegen_flags: <defaults>
</compile_context>

<pallas_src>
import math

import jax
import jax.numpy as jnp
from jax import lax
from jax.experimental import pallas as pl
from jax.experimental.pallas import tpu as pltpu

HIDDEN = 32
LANES = 128


def _silu_tanh(x):
    # silu(x) = x * sigmoid(x) = 0.5 * x * (1 + tanh(x/2)); one EUP op (tanh),
    # the extra mul/add land on otherwise-idle VALU slots.
    return 0.5 * x * (1.0 + jnp.tanh(0.5 * x))


def fnet_kernel(t_ref, mats_ref, vecs_ref, o_ref):
    # t_ref / o_ref : (block_rows, 128) lane-dense batch slab.
    # mats_ref      : (2, 32, 32)  [W2, W3] in PyTorch (out, in) layout.
    # vecs_ref      : (32, 8) columns: [w1, b1, b2, b3, w4, b4, 0, 0].
    w2 = mats_ref[0]                      # (32, 32)
    w3 = mats_ref[1]                      # (32, 32)
    vecs = vecs_ref[...]                  # (32, 8) -- loaded once, hoisted
    w1c = vecs[:, 0:1]                    # (32, 1)
    b1c = vecs[:, 1:2]
    b2c = vecs[:, 2:3]
    b3c = vecs[:, 3:4]
    w4c = vecs[:, 4:5]
    b4 = vecs[0:1, 5:6]                   # (1, 1)

    block_rows = t_ref.shape[0]

    def row_body(r, carry):
        t_row = t_ref[pl.ds(r, 1), :]                                    # (1, 128)
        # layer 1: 1 -> 32, K=1  ->  pure VPU broadcast (no MXU push).
        h = _silu_tanh(w1c * t_row + b1c)                                # (32, 128)
        # layers 2, 3: 32 -> 32 on the MXU, f32 accumulate.
        h = _silu_tanh(jnp.dot(w2, h, preferred_element_type=jnp.float32) + b2c)
        h = _silu_tanh(jnp.dot(w3, h, preferred_element_type=jnp.float32) + b3c)
        # layer 4: 32 -> 1  ->  XLU sublane reduce; keeps the store lane-dense.
        y = jnp.sum(w4c * h, axis=0, keepdims=True) + b4                 # (1, 128)
        o_ref[pl.ds(r, 1), :] = y
        return carry

    lax.fori_loop(0, block_rows, row_body, 0)


def make_params(key):
    """Deterministic init matching torch.nn.Linear defaults.

    PyTorch layout: weight (out_features, in_features), bias (out_features,)."""
    ks = jax.random.split(key, 8)
    dims = (1, HIDDEN, HIDDEN, HIDDEN, 1)
    params = []
    for i in range(4):
        fan_in, fan_out = dims[i], dims[i + 1]
        bound = 1.0 / math.sqrt(fan_in)
        w = jax.random.uniform(ks[2 * i], (fan_out, fan_in), jnp.float32,
                               minval=-bound, maxval=bound)
        b = jax.random.uniform(ks[2 * i + 1], (fan_out,), jnp.float32,
                               minval=-bound, maxval=bound)
        params.append((w, b))
    return params


def pack_params(params):
    """Pre-pack the 8 tiny parameter tensors into 2 arrays (fewer DMA descriptors)."""
    (w1, b1), (w2, b2), (w3, b3), (w4, b4) = params
    mats = jnp.stack([w2, w3], axis=0).astype(jnp.float32)          # (2, 32, 32)
    vecs = jnp.zeros((HIDDEN, 8), jnp.float32)
    vecs = vecs.at[:, 0].set(w1[:, 0])       # layer-1 weight column
    vecs = vecs.at[:, 1].set(b1)
    vecs = vecs.at[:, 2].set(b2)
    vecs = vecs.at[:, 3].set(b3)
    vecs = vecs.at[:, 4].set(w4[0, :])       # layer-4 weight column
    vecs = vecs.at[:, 5].set(b4[0])          # layer-4 bias
    return mats, vecs


def fnet_forward(t, params, *, block_rows=1024):
    """Pallas implementation of FNetwork.forward: t (N,) -> (N,)."""
    n = t.shape[0]
    assert n >= 1

    # Lane-dense layout: pad the batch up to whole (rows, 128) slabs, rows % 8 == 0.
    rows_needed = max(8, -(-n // LANES))
    rows_needed = -(-rows_needed // 8) * 8
    br = min(block_rows, rows_needed)
    br = max(8, (br // 8) * 8)
    total_rows = -(-rows_needed // br) * br
    n_pad = total_rows * LANES

    t_flat = jnp.asarray(t, jnp.float32).reshape(-1)
    if n_pad != n:
        t_flat = jnp.pad(t_flat, (0, n_pad - n))
    t2 = t_flat.reshape(total_rows, LANES)

    mats, vecs = pack_params(params)

    cost = pl.CostEstimate(
        flops=2 * n_pad * (HIDDEN + HIDDEN * HIDDEN + HIDDEN * HIDDEN + HIDDEN),
        transcendentals=3 * HIDDEN * n_pad,
        bytes_accessed=8 * n_pad + 4 * (mats.size + vecs.size),
    )

    out = pl.pallas_call(
        fnet_kernel,
        out_shape=jax.ShapeDtypeStruct((total_rows, LANES), jnp.float32),
        grid_spec=pltpu.PrefetchScalarGridSpec(
            num_scalar_prefetch=0,
            grid=(total_rows // br,),
            in_specs=[
                pl.BlockSpec((br, LANES), lambda i: (i, 0)),       # batch slab
                pl.BlockSpec(mats.shape, lambda i: (0, 0, 0)),     # packed 32x32 weights
                pl.BlockSpec(vecs.shape, lambda i: (0, 0)),        # packed vectors/biases
            ],
            out_specs=pl.BlockSpec((br, LANES), lambda i: (i, 0)),
        ),
        compiler_params=pltpu.CompilerParams(
            dimension_semantics=("parallel",),
            vmem_limit_bytes=32 * 1024 * 1024,
        ),
        cost_estimate=cost,
    )(t2, mats, vecs)

    return out.reshape(-1)[:n]


def fnet_reference(t, params):
    """Pure-JAX reference of the same forward pass (standard sigmoid-form SiLU)."""
    x = t.reshape(-1, 1).astype(jnp.float32)
    (w1, b1), (w2, b2), (w3, b3), (w4, b4) = params
    silu = lambda z: z * jax.nn.sigmoid(z)
    h = silu(x @ w1.T + b1)
    h = silu(h @ w2.T + b2)
    h = silu(h @ w3.T + b3)
    y = h @ w4.T + b4
    return y.reshape(-1)


# TODO(synk): gradt (vmap of jacfwd of the scalar network) is not implemented as a
# separate kernel; only forward() is reproduced here.

if __name__ == "__main__":
    key = jax.random.PRNGKey(0)
    k_param, k_in = jax.random.split(key)

    params = make_params(k_param)

    N = 6000  # deliberately not a multiple of 128 to exercise the padded tail
    t = jax.random.uniform(k_in, (N,), jnp.float32, minval=0.0, maxval=1.0)

    # Small block_rows here so the demo runs a multi-step grid; the production
    # default (block_rows=1024) gives ~512 KiB lane-dense tiles per buffer.
    y = fnet_forward(t, params, block_rows=16)
    y = jax.block_until_ready(y)

    y_ref = fnet_reference(t, params)
    assert y.shape == (N,)
    assert jnp.allclose(y, y_ref, atol=1e-5, rtol=1e-5), (
        f"mismatch: max err {jnp.max(jnp.abs(y - y_ref))}")

    print("KERNEL_OK")
</pallas_src>

<mosaic_0001>
module attributes {stable_mosaic.version = 11 : i64} {
  func.func @fnet_kernel(%arg0: i32, %arg1: memref<16x128xf32, #tpu.memory_space<vmem>>, %arg2: memref<2x32x32xf32, #tpu.memory_space<vmem>>, %arg3: memref<32x8xf32, #tpu.memory_space<vmem>>, %arg4: memref<16x128xf32, #tpu.memory_space<vmem>>) attributes {dimension_semantics = [#tpu.dimension_semantics<parallel>], iteration_bounds = array<i64: 3>, scalar_prefetch = 0 : i64, scratch_operands = 0 : i64, tpu.core_type = #tpu.core_type<tc>, window_params = [{transform_indices = @transform_0, window_bounds = array<i64: 16, 128>}, {pipeline_mode = #tpu.pipeline_mode<synchronous>, transform_indices = @transform_1, window_bounds = array<i64: 2, 32, 32>}, {pipeline_mode = #tpu.pipeline_mode<synchronous>, transform_indices = @transform_2, window_bounds = array<i64: 32, 8>}, {transform_indices = @transform_3, window_bounds = array<i64: 16, 128>}]} {
    %c0 = arith.constant 0 : index
    %c0_0 = arith.constant 0 : index
    %c0_1 = arith.constant 0 : index
    %0 = vector.load %arg2[%c0, %c0_0, %c0_1] : memref<2x32x32xf32, #tpu.memory_space<vmem>>, vector<1x32x32xf32>
    %1 = vector.shape_cast %0 : vector<1x32x32xf32> to vector<32x32xf32>
    %c1 = arith.constant 1 : index
    %c0_2 = arith.constant 0 : index
    %c0_3 = arith.constant 0 : index
    %2 = vector.load %arg2[%c1, %c0_2, %c0_3] : memref<2x32x32xf32, #tpu.memory_space<vmem>>, vector<1x32x32xf32>
    %3 = vector.shape_cast %2 : vector<1x32x32xf32> to vector<32x32xf32>
    %c0_4 = arith.constant 0 : index
    %c0_5 = arith.constant 0 : index
    %4 = vector.load %arg3[%c0_4, %c0_5] : memref<32x8xf32, #tpu.memory_space<vmem>>, vector<32x8xf32>
    %5 = vector.extract_strided_slice %4 {offsets = [0, 0], sizes = [32, 1], strides = [1, 1]} : vector<32x8xf32> to vector<32x1xf32>
    %6 = vector.extract_strided_slice %4 {offsets = [0, 1], sizes = [32, 1], strides = [1, 1]} : vector<32x8xf32> to vector<32x1xf32>
    %7 = vector.extract_strided_slice %4 {offsets = [0, 2], sizes = [32, 1], strides = [1, 1]} : vector<32x8xf32> to vector<32x1xf32>
    %8 = vector.extract_strided_slice %4 {offsets = [0, 3], sizes = [32, 1], strides = [1, 1]} : vector<32x8xf32> to vector<32x1xf32>
    %9 = vector.extract_strided_slice %4 {offsets = [0, 4], sizes = [32, 1], strides = [1, 1]} : vector<32x8xf32> to vector<32x1xf32>
    %10 = vector.extract_strided_slice %4 {offsets = [0, 5], sizes = [1, 1], strides = [1, 1]} : vector<32x8xf32> to vector<1x1xf32>
    %c0_i32 = arith.constant 0 : i32
    %c16_i32 = arith.constant 16 : i32
    %11 = arith.addi %c0_i32, %c16_i32 : i32
    %c1_i32 = arith.constant 1 : i32
    scf.for %arg5 = %c0_i32 to %11 step %c1_i32  : i32 {
      %12 = arith.index_cast %arg5 : i32 to index
      %c0_7 = arith.constant 0 : index
      %13 = vector.load %arg1[%12, %c0_7] : memref<16x128xf32, #tpu.memory_space<vmem>>, vector<1x128xf32>
      %14 = vector.broadcast %5 : vector<32x1xf32> to vector<32x128xf32>
      %15 = vector.broadcast %13 : vector<1x128xf32> to vector<32x128xf32>
      %16 = arith.mulf %14, %15 : vector<32x128xf32>
      %17 = vector.broadcast %6 : vector<32x1xf32> to vector<32x128xf32>
      %18 = arith.addf %16, %17 : vector<32x128xf32>
      %cst = arith.constant 5.000000e-01 : f32
      %19 = vector.broadcast %cst : f32 to vector<32x128xf32>
      %20 = arith.mulf %19, %18 : vector<32x128xf32>
      %cst_8 = arith.constant 5.000000e-01 : f32
      %21 = vector.broadcast %cst_8 : f32 to vector<32x128xf32>
      %22 = arith.mulf %21, %18 : vector<32x128xf32>
      %23 = math.tanh %22 : vector<32x128xf32>
      %cst_9 = arith.constant 1.000000e+00 : f32
      %24 = vector.broadcast %cst_9 : f32 to vector<32x128xf32>
      %25 = arith.addf %24, %23 : vector<32x128xf32>
      %26 = arith.mulf %20, %25 : vector<32x128xf32>
      %cst_10 = arith.constant dense<0.000000e+00> : vector<32x128xf32>
      %27 = tpu.matmul %1, %26, %cst_10 {dimension_numbers = #tpu.dot_dimension_numbers<[1], [0], [0], [1], [0, 0, 1, 1], [], []>} : vector<32x32xf32>, vector<32x128xf32>, vector<32x128xf32> -> vector<32x128xf32>
      %28 = vector.broadcast %7 : vector<32x1xf32> to vector<32x128xf32>
      %29 = arith.addf %27, %28 : vector<32x128xf32>
      %cst_11 = arith.constant 5.000000e-01 : f32
      %30 = vector.broadcast %cst_11 : f32 to vector<32x128xf32>
      %31 = arith.mulf %30, %29 : vector<32x128xf32>
      %cst_12 = arith.constant 5.000000e-01 : f32
      %32 = vector.broadcast %cst_12 : f32 to vector<32x128xf32>
      %33 = arith.mulf %32, %29 : vector<32x128xf32>
      %34 = math.tanh %33 : vector<32x128xf32>
      %cst_13 = arith.constant 1.000000e+00 : f32
      %35 = vector.broadcast %cst_13 : f32 to vector<32x128xf32>
      %36 = arith.addf %35, %34 : vector<32x128xf32>
      %37 = arith.mulf %31, %36 : vector<32x128xf32>
      %cst_14 = arith.constant dense<0.000000e+00> : vector<32x128xf32>
      %38 = tpu.matmul %3, %37, %cst_14 {dimension_numbers = #tpu.dot_dimension_numbers<[1], [0], [0], [1], [0, 0, 1, 1], [], []>} : vector<32x32xf32>, vector<32x128xf32>, vector<32x128xf32> -> vector<32x128xf32>
      %39 = vector.broadcast %8 : vector<32x1xf32> to vector<32x128xf32>
      %40 = arith.addf %38, %39 : vector<32x128xf32>
      %cst_15 = arith.constant 5.000000e-01 : f32
      %41 = vector.broadcast %cst_15 : f32 to vector<32x128xf32>
      %42 = arith.mulf %41, %40 : vector<32x128xf32>
      %cst_16 = arith.constant 5.000000e-01 : f32
      %43 = vector.broadcast %cst_16 : f32 to vector<32x128xf32>
      %44 = arith.mulf %43, %40 : vector<32x128xf32>
      %45 = math.tanh %44 : vector<32x128xf32>
      %cst_17 = arith.constant 1.000000e+00 : f32
      %46 = vector.broadcast %cst_17 : f32 to vector<32x128xf32>
      %47 = arith.addf %46, %45 : vector<32x128xf32>
      %48 = arith.mulf %42, %47 : vector<32x128xf32>
      %49 = vector.broadcast %9 : vector<32x1xf32> to vector<32x128xf32>
      %50 = arith.mulf %49, %48 : vector<32x128xf32>
      %cst_18 = arith.constant dense<0.000000e+00> : vector<128xf32>
      %51 = vector.multi_reduction <add>, %50, %cst_18 [0] : vector<32x128xf32> to vector<128xf32>
      %52 = vector.shape_cast %51 : vector<128xf32> to vector<1x128xf32>
      %53 = vector.broadcast %10 : vector<1x1xf32> to vector<1x128xf32>
      %54 = arith.addf %52, %53 : vector<1x128xf32>
      %55 = arith.index_cast %arg5 : i32 to index
      %c0_19 = arith.constant 0 : index
      %56 = vector.load %arg4[%55, %c0_19] : memref<16x128xf32, #tpu.memory_space<vmem>>, vector<1x128xf32>
      tpu.vector_store %arg4[%55, %c0_19], %54 {strides = array<i32>} : memref<16x128xf32, #tpu.memory_space<vmem>>, vector<1x128xf32>,
    }
    %c16_i32_6 = arith.constant 16 : i32
    return
  }
  func.func @transform_0(%arg0: i32) -> (i32, i32) {
    %c0_i32 = arith.constant 0 : i32
    %c0_i32_0 = arith.constant 0 : i32
    return %arg0, %c0_i32 : i32, i32
  }
  func.func @transform_1(%arg0: i32) -> (i32, i32, i32) {
    %c0_i32 = arith.constant 0 : i32
    %c0_i32_0 = arith.constant 0 : i32
    %c0_i32_1 = arith.constant 0 : i32
    %c0_i32_2 = arith.constant 0 : i32
    return %c0_i32, %c0_i32_0, %c0_i32_1 : i32, i32, i32
  }
  func.func @transform_2(%arg0: i32) -> (i32, i32) {
    %c0_i32 = arith.constant 0 : i32
    %c0_i32_0 = arith.constant 0 : i32
    %c0_i32_1 = arith.constant 0 : i32
    return %c0_i32, %c0_i32_0 : i32, i32
  }
  func.func @transform_3(%arg0: i32) -> (i32, i32) {
    %c0_i32 = arith.constant 0 : i32
    %c0_i32_0 = arith.constant 0 : i32
    return %arg0, %c0_i32 : i32, i32
  }
}

</mosaic_0001>

<bundles_post_ra>
// kernel: tpu_custom_call.1
= control target key start
LH: loop header
LB: loop body
LE: loop exit
PB: predicated region body
PF: predicated region fallthrough
CT: control target
= control target key end

     0   :  { %8 = vsyncpa [#allocation3], 0  ;;  %s1347_s0 = inlined_call_operand.hbm [shape: f32[48,128], index: 0, kind: input, shape index: {}]   ;;  %s1348_s1 = inlined_call_operand.hbm [shape: f32[2,32,32], index: 1, kind: input, shape index: {}]   ;;  %s1349_s2 = inlined_call_operand.vmem [shape: f32[32,8], index: 2, kind: input, shape index: {}]   ;;  %s1350_s3 = inlined_call_operand.hbm [shape: f32[48,128], index: 3, kind: output, shape index: {}]  }
   0x1   :  { %10 = vsyncpa [#allocation3 + $0x1], 0 }
   0x2   :  { %11 = vsyncpa [#allocation6], 0 }
   0x3   :  { %12 = vsyncpa [#allocation4], 0 }
   0x4   :  { %14 = vsyncpa [#allocation4 + $0x1], 0  ;;  %s1059_s12 = smov 0   ;;  %s1061_s13 = smov 0  }
   0x5   :  { %s1063_s14 = smov 0   ;;  %s1065_s15 = smov 0  }
   0x6 LB: > { %s1080_s16 = sadd.s32 4294967295, %s1020_s15   ;;  %s690_s17 = sadd.s32 4294967294, %s1020_s15   ;;  %s1020_s15 = sphi %s1065_s15, %s1369_s15   ;;  %s1016_s14 = sphi %s1063_s14, %s1368_s14   ;;  %s1012_s13 = sphi %s1061_s13, %s1367_s13   ;;  %s1008_s12 = sphi %s1059_s12, %s1366_s12  }
   0x7   : > { %p40_p0 = scmp.ne.s32.totalorder %s1012_s13, %s1008_s12  ;;  %p1351_p1 = scmp.eq.s32.totalorder %s1080_s16, 0 }
   0x8   : > { %p112_p3 = scmp.eq.s32.totalorder %s690_s17, 2  ;;  %p691_p5 = scmp.ge.s32.totalorder %s1020_s15, 1 }
   0x9   : > { %p1089_p4 = por %p1351_p1, %p40_p0  ;;  %p119_p7 = scmp.lt.s32.totalorder %s1020_s15, 4 }
   0xa   : > { %p1094_p6 = por %p112_p3, %p40_p0  ;;  %s1026_s21 = smov [#allocation5]  }
   0xb   : > { %s1354_s18 = scalar_select %p1089_p4, 1, 0 }
   0xc   : > { %s1355_s19 = scalar_select %p1094_p6, 1, 0 }
   0xd   : > { %p1099_p8 = pnand %p691_p5, %p119_p7  ;;  %s131_s22 = sshll.u32 %s1026_s21, 4  ;;  %s132_s22 = int_to_ptr.vmem [resolvable:$true] %s131_s22 }
   0xe   : > { %s1112_s24 = sadd.s32 1, %s1020_s15   ;;  %s27_s25 = sadd.s32 1, %s1016_s14 }
   0xf   : > { %s1356_s20 = scalar_select %p1099_p8, 1, 0 }
  0x10   : > { %p785_p9 = pneg %p1099_p8  ;;  %s24_s26 = ssub.s32 %s1020_s15, %s1112_s24 }
  0x11   : > { %s888_s29 = scalar_lea.hbm %s1348_s1, 1024 }
  0x12   : > { %p1107_p10 = pnand %p785_p9, %p1351_p1  ;;  %p889_p11 = scmp.ne.s32.totalorder %s1348_s1, %s888_s29 }
  0x13   : > { %p895_p3 = scmp.lt.u32.totalorder %s888_s29, %s1348_s1 }
  0x14   : > { %p890_p12 = pneg %p1107_p10 }
  0x16   : > { %p891_p13 = pnand %p890_p12, %p889_p11 }
  0x18   : > { %p892_p0 = pneg %p891_p13 }
  0x1a   : > { %p897_p5 = pnand %p895_p3, %p892_p0 }
  0x1c   : > { %900 = shalt.err (!%p897_p5)
}
  0x1d   : > { %s901_s7 = scalar_lea.vmem %s132_s22, 1024  ;;  %p909_p2 = scmp.lt.s32.totalorder %s132_s22, %s132_s22 }
  0x1e   : > { %p902_p7 = scmp.ne.s32.totalorder %s132_s22, %s901_s7  ;;  %p910_p6 = scmp.lt.s32.totalorder %s901_s7, %s901_s7 }
  0x20   : > { %p904_p9 = pnand %p902_p7, %p890_p12  ;;  %p911_p4 = por %p910_p6, %p909_p2 }
  0x22   : > { %p905_p1 = pneg %p904_p9 }
  0x24   : > { %p912_p8 = pnand %p911_p4, %p905_p1 }
  0x26   : > { %915 = shalt.err (!%p912_p8)
}
  0x27   : > { %s1027_s8 = smov 128   ;;  %s1028_s9 = smov 8  }
  0x28   : > { %788 = dma.hbm_to_vmem [thread:$0]  (!%p1107_p10), %s1348_s1, 1024, %s132_s22, [#allocation6], %s1027_s8, %s1027_s8, %s1028_s9  }
  0x29   : > { %p25_p1 = scmp.eq.s32.totalorder %s24_s26, 0  ;;  %p34_p2 = scmp.ne.s32.totalorder %s1016_s14, %s1012_s13 }
  0x2a   : > { %p35_p4 = scmp.eq.s32.totalorder %s1020_s15, 0  ;;  %p798_p6 = scmp.lt.s32.totalorder %s1020_s15, 3 }
  0x2b   : > { %s1141_s17 = scalar_select %p25_p1, %s1016_s14, %s27_s25  }
  0x2c   : > { %p36_p8 = por %p35_p4, %p34_p2  ;;  %p1358_p11 = scmp.eq.s32.totalorder %s1080_s16, 2 }
  0x2d   : > { %s148_s23 = sand.u32 1, %s1016_s14   ;;  %s715_s27 = sshll.u32 %s1020_s15, 8 }
  0x2e   : > { %p1145_p12 = por %p1358_p11, %p34_p2  ;;  %s694_s28 = sshll.u32 %s148_s23, 4 }
  0x2f   : > { %s1154_s4 = scalar_lea.hbm %s1347_s0, %s715_s27  ;;  %s152_s22 = scalar_lea.vmem [#allocation2], %s694_s28 }
  0x30   : > { %s159_s25 = sshll.u32 %s152_s22, 4  ;;  %p1156_p10 = pnand %p798_p6, %p36_p8  ;;  %s1160_s25 = int_to_ptr.vmem [resolvable:$true] %s159_s25 }
  0x31   : > { %s1162_s5 = scalar_lea.sflag [#allocation3], %s148_s23  ;;  %s916_s6 = scalar_lea.hbm %s1154_s4, 256 }
  0x32   : > { %p917_p13 = scmp.ne.s32.totalorder %s1154_s4, %s916_s6  ;;  %p918_p0 = pneg %p1156_p10 }
  0x33   : > { %s921_s11 = scalar_lea.hbm %s1347_s0, 768  ;;  %p922_p7 = scmp.lt.u32.totalorder %s1154_s4, %s1347_s0 }
  0x34   : > { %p919_p3 = pnand %p918_p0, %p917_p13  ;;  %p923_p9 = scmp.lt.u32.totalorder %s921_s11, %s916_s6 }
  0x35   : > { %p925_p2 = scmp.lt.u32.totalorder %s916_s6, %s1154_s4 }
  0x36   : > { %p920_p5 = pneg %p919_p3  ;;  %p924_p1 = por %p923_p9, %p922_p7 }
  0x38   : > { %p926_p4 = por %p925_p2, %p924_p1 }
  0x3a   : > { %p927_p6 = pnand %p926_p4, %p920_p5 }
  0x3c   : > { %930 = shalt.err (!%p927_p6)
}
  0x3d   : > { %s931_s23 = scalar_lea.vmem %s1160_s25, 256  ;;  %s1029_s29 = smov [#allocation2]  }
  0x3e   : > { %p932_p8 = scmp.ne.s32.totalorder %s1160_s25, %s931_s23  ;;  %s936_s30 = sshll.u32 %s1029_s29, 4  ;;  %s937_s30 = int_to_ptr.vmem [resolvable:$false] %s936_s30 }
  0x3f   : > { %s938_s22 = scalar_lea.vmem %s937_s30, 512  ;;  %p939_p3 = scmp.lt.s32.totalorder %s1160_s25, %s937_s30 }
  0x40   : > { %p934_p11 = pnand %p932_p8, %p918_p0  ;;  %p940_p7 = scmp.lt.s32.totalorder %s938_s22, %s931_s23 }
  0x42   : > { %p935_p13 = pneg %p934_p11  ;;  %p941_p9 = por %p940_p7, %p939_p3 }
  0x44   : > { %p942_p1 = pnand %p941_p9, %p935_p13 }
  0x46   : > { %945 = shalt.err (!%p942_p1)
}
  0x47   : > { %792 = dma.hbm_to_vmem [thread:$0]  (!%p1156_p10), %s1154_s4, 256, %s1160_s25, %s1162_s5, %s1027_s8, %s1027_s8, %s1028_s9  }
  0x48   : > { %p1361_p0 = scmp.ne.s32.totalorder %s1356_s20, 0 }
  0x49   : > { %s1196_s6 = sand.u32 (!%p1361_p0), 1, %s1012_s13   ;;  %p1362_p5 = scmp.ne.s32.totalorder (!%p1361_p0), %s1354_s18, 0 }
  0x4a   : > { %171 = sbr.rel (%p1361_p0) target bundleno = 772 (0x304), region = 32  ;;  %s698_s7 = sshll.u32 (!%p1361_p0), %s1196_s6, 4 }
  0x4b   : > { %s174_s10 = scalar_lea.sflag (!%p1361_p0), [#allocation3], %s1196_s6  ;;  %s1200_s11 = scalar_lea.vmem (!%p1361_p0), [#allocation2], %s698_s7 }
  0x51   : > { %995 = dma.done.wait (%p1362_p5), %s174_s10, 256  }
  0x52   : > { %997 = vsyncadd (%p1362_p5), %s174_s10, 4294967040  ;;  %p1363_p10 = scmp.eq.s32.totalorder %s1080_s16, 0 }
  0x54   : > { %999 = dma.done.wait (%p1363_p10), [#allocation6], 1024   ;;  %p1364_p2 = pmov %p1363_p10 }
  0x55   : > { %v1210_v0 = vld [vmem:[#allocation5] sm:$0xff]  ;;  %v1212_v1 = vld [vmem:[#allocation5 + $0x8] sm:$0xff]  ;;  %v1214_v2 = vld [vmem:[#allocation5 + $0x10] sm:$0xff]  ;;  %s1246_s27 = scalar_lea.vmem [#allocation7], %s698_s7  ;;  %s1248_s28 = smov 0  }
  0x56   : > { %1001 = vsyncadd (%p1364_p2), [#allocation6], 4294966272  ;;  %v1216_v3 = vld [vmem:[#allocation5 + $0x18] sm:$0xff]  ;;  %v1218_v4 = vld [vmem:[#allocation5 + $0x20] sm:$0xff] }
  0x57   : > { %v1220_v5 = vld [vmem:[#allocation5 + $0x28] sm:$0xff]  ;;  %v1222_v6 = vld [vmem:[#allocation5 + $0x30] sm:$0xff]  ;;  %v1224_v7 = vld [vmem:[#allocation5 + $0x38] sm:$0xff] }
  0x58   : > { %v1229_v8 = vld [vmem:[%s1349_s2] sm:$0xff]  ;;  %v1234_v9 = vld [vmem:[%s1349_s2 + $0x8] sm:$0xff]  ;;  %v1239_v10 = vld [vmem:[%s1349_s2 + $0x10] sm:$0xff] }
  0x59   : > { %v1244_v11 = vld [vmem:[%s1349_s2 + $0x18] sm:$0xff] }
  0x5a LB: >> { %v1030_v12 = vmov 1   ;;  %v1031_v13 = vmov 0   ;;  %vm307_vm0 = vcmask 261120   ;;  %v1032_v14 = vmov 2   ;;  %s225_s23 = scalar_lea.vmem %s1200_s11, %s1024_s28 [#allocation2]  ;;  %s584_s29 = scalar_lea.vmem %s1246_s27, %s1024_s28 [#allocation7]  ;;  %s1024_s28 = sphi %s1248_s28, %s224_s28  }
  0x5b   : >> { %853 = vset.pattern.permute.xlu1 %v1030_v12  ;;  %852 = vset.pattern.permute.xlu0 %v1031_v13  ;;  %v701_v15 = vld [vmem:[%s225_s23] ss:$0 sm:$0xff]  ;;  %v1033_v50 = vmov 3   ;;  %v1034_v51 = vmov 4   ;;  %v1035_v52 = vmov 5   ;;  %s224_s28 = sadd.s32 1, %s1024_s28  }
  0x5c   : >> { %256 = vperm.xlu1 %853, %v1229_v8   ;;  %229 = vperm.xlu0 %852, %v1229_v8   ;;  %p221_p4 = scmp.ge.s32.totalorder %s224_s28, 16  }
  0x5d   : >> { %741 = vmatprep.mubr.msk.f32.mxu0 %vm307_vm0, %v1210_v0  ;;  %755 = vmatprep.mubr.msk.f32.mxu1 %vm307_vm0, %v1218_v4  ;;  %s716_s30 = sshll.u32 (%p221_p4), %s1080_s16, 8  ;;  %s600_s18 = sshll.u32 (%p221_p4), %s1246_s27, 4  ;;  %s1304_s18 = int_to_ptr.vmem [resolvable:$true] %s600_s18 }
  0x5e   : > { %s1301_s10 = scalar_lea.hbm (%p221_p4), %s1350_s3, %s716_s30  ;;  %s587_s20 = scalar_lea.sflag (%p221_p4), [#allocation4], %s1196_s6 }
  0x5f   : > { %s946_s8 = scalar_lea.vmem (%p221_p4), %s1304_s18, 256  ;;  %s1036_s11 = smov (%p221_p4), [#allocation7]  }
  0x60   : >> { %260 = vperm.xlu1 %853, %v1234_v9   ;;  %234 = vperm.xlu0 %852, %v1234_v9   ;;  %p947_p6 = scmp.ne.s32.totalorder (%p221_p4), %s1304_s18, %s946_s8  ;;  %s950_s9 = sshll.u32 (%p221_p4), %s1036_s11, 4  ;;  %s951_s9 = int_to_ptr.vmem [resolvable:$false] %s950_s9 }
  0x61   : > { %s952_s16 = scalar_lea.vmem (%p221_p4), %s951_s9, 512  ;;  %p953_p13 = scmp.lt.s32.totalorder (%p221_p4), %s1304_s18, %s951_s9 }
  0x62   : > { %p948_p8 = pnand (%p221_p4), %p947_p6, %p1145_p12  ;;  %p954_p3 = scmp.lt.s32.totalorder (%p221_p4), %s952_s16, %s946_s8 }
  0x64   : >> { %854 = vset.pattern.permute.xlu1 %v1031_v13  ;;  %239 = vperm.xlu0 %852, %v1239_v10   ;;  %p949_p11 = pneg (%p221_p4), %p948_p8  ;;  %p955_p7 = por (%p221_p4), %p954_p3, %p953_p13 }
  0x65   : >> { %244 = vperm.xlu1 %854, %v1244_v11  }
  0x66   : > { %p956_p9 = pnand (%p221_p4), %p955_p7, %p949_p11 }
  0x68   : >> { %855 = vset.pattern.permute.xlu0 %v1030_v12 }
  0x69   : >> { %856 = vset.pattern.permute.xlu1 %v1030_v12  ;;  %264 = vperm.xlu0 %855, %v1239_v10  }
  0x6a   : >> { %268 = vperm.xlu1 %856, %v1244_v11  }
  0x6d   : >> { %858 = vset.pattern.permute.xlu0 %v1032_v14 }
  0x6e   : >> { %857 = vset.pattern.permute.xlu1 %v1032_v14  ;;  %296 = vperm.xlu0 %858, %v1234_v9  }
  0x6f   : >> { %292 = vperm.xlu1 %857, %v1229_v8  }
  0x72   : >> { %859 = vset.pattern.permute.xlu0 %v1033_v50 }
  0x73   : >> { %300 = vperm.xlu1 %857, %v1239_v10   ;;  %422 = vperm.xlu0 %859, %v1229_v8  }
  0x77   : >> { %304 = vperm.xlu1 %857, %v1244_v11   ;;  %434 = vperm.xlu0 %859, %v1244_v11  }
  0x7b   : >> { %860 = vset.pattern.permute.xlu1 %v1033_v50  ;;  %862 = vset.pattern.permute.xlu0 %v1034_v51 }
  0x7c   : >> { %426 = vperm.xlu1 %860, %v1234_v9   ;;  %555 = vperm.xlu0 %862, %v1234_v9  }
  0x80   : >> { %430 = vperm.xlu1 %860, %v1239_v10   ;;  %863 = vset.pattern.permute.xlu0 %v1035_v52 }
  0x81   : >> { %580 = vperm.xlu0 %863, %v1229_v8  }
  0x84   : >> { %861 = vset.pattern.permute.xlu1 %v1034_v51 }
  0x85   : >> { %551 = vperm.xlu1 %861, %v1229_v8  }
  0x89   : >> { %559 = vperm.xlu1 %861, %v1239_v10  }
  0x8d   : >> { %563 = vperm.xlu1 %861, %v1244_v11  }
  0xdb   : >> { %v257_v16 = vpop.permute.xlu1 %256  ;;  %v230_v17 = vpop.permute.xlu0 %229 }
  0xdc   : >> { %v251_v18 = vmul.f32 %v701_v15, %v230_v17 }
  0xde   : >> { %v271_v19 = vadd.f32 %v257_v16, %v251_v18 }
  0xdf   : >> { %v261_v20 = vpop.permute.xlu1 %260  ;;  %v235_v21 = vpop.permute.xlu0 %234 }
  0xe0   : >> { %v275_v22 = vmul.f32 0.5, %v271_v19  ;;  %v252_v23 = vmul.f32 %v701_v15, %v235_v21 }
  0xe2   : >> { %864 = vtanh.f32 %v275_v22  ;;  %v272_v24 = vadd.f32 %v261_v20, %v252_v23 }
  0xe3   : >> { %v240_v25 = vpop.permute.xlu0 %239 }
  0xe4   : >> { %v276_v26 = vmul.f32 0.5, %v272_v24  ;;  %v245_v27 = vpop.permute.xlu1 %244  ;;  %v253_v28 = vmul.f32 %v701_v15, %v240_v25 }
  0xe5   : >> { %v254_v29 = vmul.f32 %v701_v15, %v245_v27 }
  0xe6   : >> { %866 = vtanh.f32 %v276_v26 }
  0xe8   : >> { %v265_v30 = vpop.permute.xlu0 %264 }
  0xe9   : >> { %v273_v31 = vadd.f32 %v265_v30, %v253_v28  ;;  %v269_v32 = vpop.permute.xlu1 %268 }
  0xea   : >> { %v274_v33 = vadd.f32 %v269_v32, %v254_v29 }
  0xeb   : >> { %v277_v34 = vmul.f32 0.5, %v273_v31 }
  0xec   : >> { %v865_v35 = vpop.eup %864  ;;  %v278_v36 = vmul.f32 0.5, %v274_v33 }
  0xed   : >> { %868 = vtanh.f32 %v277_v34  ;;  %v283_v37 = vadd.f32 1.0, %v865_v35  ;;  %v297_v55 = vpop.permute.xlu0 %296 }
  0xee   : >> { %870 = vtanh.f32 %v278_v36  ;;  %v293_v53 = vpop.permute.xlu1 %292 }
  0xef   : >> { %v287_v40 = vmul.f32 %v283_v37, %v275_v22 }
  0xf0   : >> { %v867_v38 = vpop.eup %866 }
  0xf1   : >> { %v284_v39 = vadd.f32 1.0, %v867_v38 }
  0xf2   : >> { %v301_v54 = vpop.permute.xlu1 %300  ;;  %v423_v31 = vpop.permute.xlu0 %422 }
  0xf3   : >> { %v288_v41 = vmul.f32 %v284_v39, %v276_v26 }
  0xf5   : >> { %v761_v42 = vpack.c.bf16 %v288_v41, %v287_v40 }
  0xf6   : >> { %v305_v61 = vpop.permute.xlu1 %304  ;;  %v435_v37 = vpop.permute.xlu0 %434 }
  0xf7   : >> { %v869_v43 = vpop.eup %868  ;;  %762 = vmatprep.subr.bf16.mxu0 %v761_v42 }
  0xf8   : >> { %v871_v44 = vpop.eup %870  ;;  %v285_v45 = vadd.f32 1.0, %v869_v43  ;;  %764 = vmatpush3.bf16.msra.mxu0 %v761_v42 }
  0xf9   : >> { %v286_v46 = vadd.f32 1.0, %v871_v44 }
  0xfa   : >> { %v289_v47 = vmul.f32 %v285_v45, %v277_v34 }
  0xfb   : >> { %v290_v48 = vmul.f32 %v286_v46, %v278_v36  ;;  %v427_v32 = vpop.permute.xlu1 %426  ;;  %v556_v52 = vpop.permute.xlu0 %555 }
  0xfd   : >> { %v765_v49 = vpack.c.bf16 %v290_v48, %v289_v47 }
  0xff   : >> { %766 = vmatprep.subr.bf16.mxu0 %v765_v49  ;;  %v431_v41 = vpop.permute.xlu1 %430 }
 0x100   : >> { %768 = vmatpush3.bf16.msra.mxu0 %v765_v49 }
 0x103   : >> { %742 = vmatmul.mubr.msk.f32.vlgmr.msra.gmra.mrb[0].mxu0 %vm307_vm0, %v1212_v1 }
 0x104   : >> { %744 = vmatprep.mubr.msk.f32.mxu0 %vm307_vm0, %v1214_v2  ;;  %v552_v47 = vpop.permute.xlu1 %551 }
 0x107   : >> { %745 = vmatmul.mubr.msk.f32.gmra.mrb[2].mxu0 %vm307_vm0, %v1216_v3 }
 0x1d6   : >> { %v743_v56 = vpop.f32.mrb[0].mxu0 }
 0x1d7   : >> { %v392_v57 = vadd.f32 %v743_v56, %v297_v55  ;;  %v386_v58 = vpop.f32.mrb[1].mxu0 }
 0x1d8   : >> { %v387_v59 = vadd.f32 %v386_v58, %v293_v53 }
 0x1d9   : >> { %v406_v60 = vmul.f32 0.5, %v392_v57  ;;  %v560_v57 = vpop.permute.xlu1 %559 }
 0x1da   : >> { %v405_v62 = vmul.f32 0.5, %v387_v59  ;;  %v746_v63 = vpop.f32.mrb[2].mxu0 }
 0x1db   : >> { %872 = vtanh.f32 %v406_v60  ;;  %v402_v12 = vadd.f32 %v746_v63, %v305_v61  ;;  %v396_v13 = vpop.f32.mrb[3].mxu0 }
 0x1dc   : >> { %874 = vtanh.f32 %v405_v62  ;;  %v397_v14 = vadd.f32 %v396_v13, %v301_v54 }
 0x1dd   : >> { %v408_v15 = vmul.f32 0.5, %v402_v12 }
 0x1de   : >> { %v407_v16 = vmul.f32 0.5, %v397_v14  ;;  %v564_v14 = vpop.permute.xlu1 %563 }
 0x1df   : >> { %876 = vtanh.f32 %v408_v15 }
 0x1e0   : >> { %878 = vtanh.f32 %v407_v16 }
 0x1e5   : >> { %v873_v17 = vpop.eup %872 }
 0x1e6   : >> { %v875_v18 = vpop.eup %874  ;;  %v414_v19 = vadd.f32 1.0, %v873_v17 }
 0x1e7   : >> { %v413_v20 = vadd.f32 1.0, %v875_v18 }
 0x1e8   : >> { %v418_v21 = vmul.f32 %v414_v19, %v406_v60 }
 0x1e9   : >> { %v877_v22 = vpop.eup %876  ;;  %v417_v23 = vmul.f32 %v413_v20, %v405_v62 }
 0x1ea   : >> { %v879_v24 = vpop.eup %878  ;;  %v416_v25 = vadd.f32 1.0, %v877_v22 }
 0x1eb   : >> { %v415_v26 = vadd.f32 1.0, %v879_v24  ;;  %v769_v27 = vpack.c.bf16 %v418_v21, %v417_v23  ;;  %v581_v23 = vpop.permute.xlu0 %580 }
 0x1ec   : >> { %v420_v28 = vmul.f32 %v416_v25, %v408_v15 }
 0x1ed   : >> { %v419_v29 = vmul.f32 %v415_v26, %v407_v16  ;;  %770 = vmatprep.subr.bf16.mxu1 %v769_v27 }
 0x1ee   : >> { %772 = vmatpush3.bf16.msra.mxu1 %v769_v27 }
 0x1ef   : >> { %v773_v30 = vpack.c.bf16 %v420_v28, %v419_v29 }
 0x1f1   : >> { %774 = vmatprep.subr.bf16.mxu1 %v773_v30 }
 0x1f2   : >> { %776 = vmatpush3.bf16.msra.mxu1 %v773_v30 }
 0x1f5   : >> { %756 = vmatmul.mubr.msk.f32.vlgmr.msra.gmra.mrb[0].mxu1 %vm307_vm0, %v1220_v5 }
 0x1f6   : >> { %758 = vmatprep.mubr.msk.f32.mxu1 %vm307_vm0, %v1222_v6 }
 0x1f9   : >> { %759 = vmatmul.mubr.msk.f32.gmra.mrb[2].mxu1 %vm307_vm0, %v1224_v7 }
 0x2c8   : >> { %v757_v33 = vpop.f32.mrb[0].mxu1 }
 0x2c9   : >> { %v521_v34 = vadd.f32 %v757_v33, %v427_v32  ;;  %v515_v35 = vpop.f32.mrb[1].mxu1 }
 0x2ca   : >> { %v516_v36 = vadd.f32 %v515_v35, %v423_v31 }
 0x2cb   : >> { %v535_v38 = vmul.f32 0.5, %v521_v34 }
 0x2cc   : >> { %v534_v39 = vmul.f32 0.5, %v516_v36  ;;  %v760_v40 = vpop.f32.mrb[2].mxu1 }
 0x2cd   : >> { %880 = vtanh.f32 %v535_v38  ;;  %v531_v42 = vadd.f32 %v760_v40, %v435_v37  ;;  %v525_v43 = vpop.f32.mrb[3].mxu1 }
 0x2ce   : >> { %882 = vtanh.f32 %v534_v39  ;;  %v526_v44 = vadd.f32 %v525_v43, %v431_v41 }
 0x2cf   : >> { %v537_v45 = vmul.f32 0.5, %v531_v42 }
 0x2d0   : >> { %v536_v46 = vmul.f32 0.5, %v526_v44 }
 0x2d1   : >> { %884 = vtanh.f32 %v537_v45 }
 0x2d2   : >> { %886 = vtanh.f32 %v536_v46 }
 0x2d7   : >> { %v881_v48 = vpop.eup %880 }
 0x2d8   : >> { %v883_v49 = vpop.eup %882  ;;  %v543_v50 = vadd.f32 1.0, %v881_v48 }
 0x2d9   : >> { %v542_v51 = vadd.f32 1.0, %v883_v49 }
 0x2da   : >> { %v547_v53 = vmul.f32 %v543_v50, %v535_v38 }
 0x2db   : >> { %v885_v54 = vpop.eup %884  ;;  %v546_v55 = vmul.f32 %v542_v51, %v534_v39 }
 0x2dc   : >> { %v887_v56 = vpop.eup %886  ;;  %v545_v58 = vadd.f32 1.0, %v885_v54  ;;  %v567_v59 = vmul.f32 %v556_v52, %v547_v53 }
 0x2dd   : >> { %v566_v60 = vmul.f32 %v552_v47, %v546_v55  ;;  %v544_v61 = vadd.f32 1.0, %v887_v56 }
 0x2de   : >> { %v549_v63 = vmul.f32 %v545_v58, %v537_v45 }
 0x2df   : >> { %v548_v62 = vmul.f32 %v544_v61, %v536_v46  ;;  %v570_v12 = vadd.f32 %v567_v59, %v566_v60 }
 0x2e0   : >> { %v569_v15 = vmul.f32 %v564_v14, %v549_v63 }
 0x2e1   : >> { %v568_v13 = vmul.f32 %v560_v57, %v548_v62 }
 0x2e3   : >> { %v571_v16 = vadd.f32 %v570_v12, %v568_v13 }
 0x2e5   : >> { %v572_v17 = vadd.f32 %v571_v16, %v569_v15 }
 0x2e7   : >> { %v573_v18 = vrot.slane %v572_v17, 4 }
 0x2e9   : >> { %v574_v19 = vadd.f32 %v573_v18, %v572_v17 }
 0x2eb   : >> { %v575_v20 = vrot.slane %v574_v19, 2 }
 0x2ed   : >> { %v576_v21 = vadd.f32 %v575_v20, %v574_v19 }
 0x2ef   : >> { %v577_v22 = vrot.slane %v576_v21, 1  ;;  %223 = sbr.rel (!%p221_p4) target bundleno = 90 (0x5a), region = 91 }
 0x2f1   : >> { %v578_v24 = vadd.f32 %v577_v22, %v576_v21 }
 0x2f3   : >> { %v583_v25 = vadd.f32 %v581_v23, %v578_v24 }
 0x2f5   : >> { %585 = vst [vmem:[%s584_s29] sm:$0x1] %v583_v25 }
 0x2f6   : > { %959 = shalt.err (!%p956_p9)
}
 0x2f7   : > { %s960_s4 = scalar_lea.hbm %s1301_s10, 256  ;;  %s964_s5 = scalar_lea.hbm %s1350_s3, 768 }
 0x2f8   : > { %p961_p1 = scmp.ne.s32.totalorder %s1301_s10, %s960_s4  ;;  %p965_p10 = scmp.lt.u32.totalorder %s1301_s10, %s1350_s3 }
 0x2f9   : > { %p966_p2 = scmp.lt.u32.totalorder %s964_s5, %s960_s4  ;;  %p968_p6 = scmp.lt.u32.totalorder %s960_s4, %s1301_s10 }
 0x2fa   : > { %p962_p0 = pnand %p961_p1, %p1145_p12 }
 0x2fb   : > { %p967_p4 = por %p966_p2, %p965_p10 }
 0x2fc   : > { %p963_p5 = pneg %p962_p0 }
 0x2fd   : > { %p969_p8 = por %p968_p6, %p967_p4 }
 0x2ff   : > { %p970_p11 = pnand %p969_p8, %p963_p5 }
 0x301   : > { %973 = shalt.err (!%p970_p11)
}
 0x302   : > { %s1037_s23 = smov 128   ;;  %s1038_s29 = smov 8  }
 0x303   : > { %783 = dma.vmem_to_hbm [thread:$0]  (%p1145_p12), %s1304_s18, 256, %s1301_s10, %s587_s20, %s1037_s23, %s1037_s23, %s1038_s29  }
 0x304 PF: > { %p800_p13 = scmp.ge.s32.totalorder %s1020_s15, 2  ;;  %s615_s30 = sand.u32 1, %s1008_s12  }
 0x305   : > { %p1365_p3 = scmp.ne.s32.totalorder %s1355_s19, 0  ;;  %s616_s22 = scalar_lea.sflag [#allocation4], %s615_s30 }
 0x307   : > { %p794_p7 = pnand %p800_p13, %p1365_p3 }
 0x309   : > { %1003 = dma.done.wait (!%p794_p7), %s616_s22, 256  }
 0x30a   : > { %1005 = vsyncadd (!%p794_p7), %s616_s22, 4294967040  ;;  %p17_p9 = scmp.ge.s32.totalorder %s1112_s24, 5   ;;  %s1366_s12 = smov %s1012_s13 }
 0x30b   : > { %s1367_s13 = smov %s1016_s14  ;;  %s1368_s14 = smov %s1141_s17 }
 0x30c   : > { %s1369_s15 = smov %s1112_s24  ;;  %19 = sbr.rel (!%p17_p9) target bundleno = 6 (0x6), region = 102 }
 0x313   :  { %621 = vsyncpa [#allocation3], 1 }
 0x314   :  { %623 = vsyncpa [#allocation3 + $0x1], 1 }
 0x315   :  { %624 = vsyncpa [#allocation6], 1 }
 0x316   :  { %625 = vsyncpa [#allocation4], 1 }
 0x317   :  { %627 = vsyncpa [#allocation4 + $0x1], 1 }

</bundles_post_ra>
